<compile_context>
chip_gen: v7x
topology: tpu7x:2x2x1
jax: 0.10.0
libtpu: 0.0.40
codegen_flags: <defaults>
</compile_context>

<pallas_src>
import math

import jax
import jax.numpy as jnp
from jax.experimental import pallas as pl
from jax.experimental.pallas import tpu as pltpu

_LANE = 128
# ~2 MiB per block -> 2 in-buffers + 2 out-buffers = ~8 MiB VMEM, well under
# the scoped-VMEM defaults on every generation (16 MiB v5e, 32 MiB v6e/v7x).
_TARGET_BLOCK_BYTES = 2 * 1024 * 1024


def _sublane_multiple(dtype):
    """Packed sublane tile height for the dtype (8 f32 / 16 bf16 / 32 int8)."""
    itemsize = jnp.dtype(dtype).itemsize
    return max(8, 32 // max(itemsize, 1))


def _copy_kernel(x_ref, o_ref):
    o_ref[...] = x_ref[...]


def _copy_slab(slab):
    """Identity-copy a lane-dense 2-D slab (rows, cols) through VMEM."""
    rows, cols = slab.shape
    dtype = slab.dtype
    itemsize = jnp.dtype(dtype).itemsize
    sub = _sublane_multiple(dtype)

    # Largest row-block such that one block is ~_TARGET_BLOCK_BYTES and the
    # second-to-last block dim is either the full extent or a multiple of the
    # packed sublane height (keeps loads/stores unmasked & vreg-aligned).
    max_rows_by_bytes = max(1, _TARGET_BLOCK_BYTES // (cols * itemsize))
    if max_rows_by_bytes >= rows:
        block_rows = rows
    else:
        block_rows = max(sub, (max_rows_by_bytes // sub) * sub)
        block_rows = min(block_rows, rows)

    grid = (pl.cdiv(rows, block_rows),)

    return pl.pallas_call(
        _copy_kernel,
        out_shape=jax.ShapeDtypeStruct((rows, cols), dtype),
        grid_spec=pltpu.PrefetchScalarGridSpec(
            num_scalar_prefetch=0,
            grid=grid,
            in_specs=[pl.BlockSpec((block_rows, cols), lambda i: (i, 0))],
            out_specs=pl.BlockSpec((block_rows, cols), lambda i: (i, 0)),
        ),
        compiler_params=pltpu.CompilerParams(
            dimension_semantics=("parallel",),
        ),
        cost_estimate=pl.CostEstimate(
            flops=0,
            transcendentals=0,
            bytes_accessed=2 * rows * cols * itemsize,
        ),
    )(slab)


def _pallas_identity_copy(flat):
    """Copy a 1-D array through VMEM with a tiled Pallas kernel."""
    n = flat.shape[0]
    if n == 0:
        return flat

    # Prefer a wide, lane-dense column count that divides n exactly: no pad,
    # no trailing slice, unmasked vector stores.
    cols = 0
    for c in (8192, 4096, 2048, 1024, 512, 256, 128):
        if n % c == 0:
            cols = c
            break

    if cols:
        out = _copy_slab(flat.reshape(n // cols, cols))
        return out.reshape(n)

    # Rare ragged fallback (n not a multiple of 128): minimal pad + slice.
    n_pad = pl.cdiv(n, _LANE) * _LANE
    padded = jnp.pad(flat, (0, n_pad - n))
    out = _copy_slab(padded.reshape(n_pad // _LANE, _LANE))
    return out.reshape(n_pad)[:n]


class Reshape:
    """JAX/Pallas equivalent of the PyTorch Reshape(nn.Module)."""

    def __init__(self, *args):
        self.shape = args

    def __call__(self, x):
        # Resolve a single -1 (torch.view semantics) with divisibility check.
        shape = list(self.shape)
        total = x.size
        if shape.count(-1) > 1:
            raise ValueError("only one dimension can be inferred")
        if -1 in shape:
            idx = shape.index(-1)
            known = 1
            for j, s in enumerate(shape):
                if j != idx:
                    known *= s
            if known == 0 or total % known != 0:
                raise ValueError(
                    f"shape {tuple(self.shape)} is invalid for input of size {total}")
            shape[idx] = total // known
        if math.prod(shape) != total:
            raise ValueError(
                f"shape {tuple(self.shape)} is invalid for input of size {total}")

        # TODO(synk): a row-major view is metadata-only in XLA; the Pallas copy
        # below exists only because a kernel is required on the hot path.
        flat = x.reshape(-1)                   # glue: metadata only
        copied = _pallas_identity_copy(flat)   # hot path: Pallas copy
        return copied.reshape(tuple(shape))    # glue: metadata only


if __name__ == "__main__":
    key = jax.random.PRNGKey(0)
    # NCHW conv-style activation: (2, 4, 16, 16)
    x = jax.random.normal(key, (2, 4, 16, 16), dtype=jnp.float32)

    # Reshape(2, 4, -1) -> (2, 4, 256), same as torch x.view(2, 4, -1)
    module = Reshape(2, 4, -1)
    y = jax.block_until_ready(module(x))

    ref = x.reshape(2, 4, 256)
    assert y.shape == (2, 4, 256), y.shape
    assert y.dtype == x.dtype
    assert bool(jnp.array_equal(y, ref))

    print("KERNEL_OK")
</pallas_src>

<mosaic_0001>
module attributes {stable_mosaic.version = 11 : i64} {
  func.func @_copy_kernel(%arg0: i32, %arg1: memref<1x2048xf32, #tpu.memory_space<vmem>>, %arg2: memref<1x2048xf32, #tpu.memory_space<vmem>>) attributes {dimension_semantics = [#tpu.dimension_semantics<parallel>], iteration_bounds = array<i64: 1>, scalar_prefetch = 0 : i64, scratch_operands = 0 : i64, tpu.core_type = #tpu.core_type<tc>, window_params = [{transform_indices = @transform_0, window_bounds = array<i64: 1, 2048>}, {transform_indices = @transform_1, window_bounds = array<i64: 1, 2048>}]} {
    %c0 = arith.constant 0 : index
    %c0_0 = arith.constant 0 : index
    %0 = vector.load %arg1[%c0, %c0_0] : memref<1x2048xf32, #tpu.memory_space<vmem>>, vector<1x2048xf32>
    %c0_1 = arith.constant 0 : index
    %c0_2 = arith.constant 0 : index
    %1 = vector.load %arg2[%c0_1, %c0_2] : memref<1x2048xf32, #tpu.memory_space<vmem>>, vector<1x2048xf32>
    tpu.vector_store %arg2[%c0_1, %c0_2], %0 {strides = array<i32>} : memref<1x2048xf32, #tpu.memory_space<vmem>>, vector<1x2048xf32>,
    return
  }
  func.func @transform_0(%arg0: i32) -> (i32, i32) {
    %c0_i32 = arith.constant 0 : i32
    %c0_i32_0 = arith.constant 0 : i32
    return %arg0, %c0_i32 : i32, i32
  }
  func.func @transform_1(%arg0: i32) -> (i32, i32) {
    %c0_i32 = arith.constant 0 : i32
    %c0_i32_0 = arith.constant 0 : i32
    return %arg0, %c0_i32 : i32, i32
  }
}

</mosaic_0001>

<bundles_post_ra>
// kernel: tpu_custom_call.1
= control target key start
LH: loop header
LB: loop body
LE: loop exit
PB: predicated region body
PF: predicated region fallthrough
CT: control target
= control target key end

     0   :  { %6 = vsyncpa [#allocation3], 0  ;;  %s126_s0 = inlined_call_operand.hbm [shape: f32[1,2048], index: 0, kind: input, shape index: {}]   ;;  %s127_s1 = inlined_call_operand.hbm [shape: f32[1,2048], index: 1, kind: output, shape index: {}]  }
   0x1   :  { %7 = vsyncpa [#allocation4], 0  ;;  %s90_s6 = smov [#allocation2]   ;;  %s42_s10 = scalar_lea.hbm %s126_s0, 256 }
   0x2   :  { %s14_s7 = sshll.u32 %s90_s6, 4  ;;  %p43_p0 = scmp.ne.s32.totalorder %s126_s0, %s42_s10  ;;  %s15_s7 = int_to_ptr.vmem [resolvable:$true] %s14_s7 }
   0x3   :  { %p46_p1 = scmp.lt.u32.totalorder %s42_s10, %s126_s0 }
   0x5   :  { %p48_p2 = pnand %p46_p1, %p43_p0 }
   0x7   :  { %51 = shalt.err (!%p48_p2)
}
   0x8   :  { %s52_s15 = scalar_lea.vmem %s15_s7, 256  ;;  %p57_p4 = scmp.lt.s32.totalorder %s15_s7, %s15_s7 }
   0x9   :  { %p53_p3 = scmp.ne.s32.totalorder %s15_s7, %s52_s15  ;;  %p58_p5 = scmp.lt.s32.totalorder %s52_s15, %s52_s15 }
   0xb   :  { %p59_p6 = por %p58_p5, %p57_p4 }
   0xd   :  { %p60_p7 = pnand %p59_p6, %p53_p3 }
   0xf   :  { %63 = shalt.err (!%p60_p7)
}
  0x10   :  { %17 = dma.hbm_to_vmem [thread:$0]  %s126_s0, 256, %s15_s7, [#allocation3]  }
  0x11   :  { %86 = dma.done.wait [#allocation3], 256  }
  0x12   :  { %87 = vsyncadd [#allocation3], 4294967040  ;;  %s91_s18 = smov [#allocation5]   ;;  %v21_v0 = vld [vmem:[#allocation2] sm:$0xff]  ;;  %v22_v1 = vld [vmem:[#allocation2 + $0x8] sm:$0xff] }
  0x13   :  { %s31_s19 = sshll.u32 %s91_s18, 4  ;;  %23 = vst [vmem:[#allocation5] sm:$0xff] %v21_v0  ;;  %24 = vst [vmem:[#allocation5 + $0x8] sm:$0xff] %v22_v1  ;;  %s32_s19 = int_to_ptr.vmem [resolvable:$true] %s31_s19 }
  0x14   :  { %s64_s20 = scalar_lea.vmem %s32_s19, 256  ;;  %p69_p9 = scmp.lt.s32.totalorder %s32_s19, %s32_s19 }
  0x15   :  { %p65_p8 = scmp.ne.s32.totalorder %s32_s19, %s64_s20  ;;  %p70_p10 = scmp.lt.s32.totalorder %s64_s20, %s64_s20 }
  0x17   :  { %p71_p11 = por %p70_p10, %p69_p9 }
  0x19   :  { %p72_p12 = pnand %p71_p11, %p65_p8 }
  0x1b   :  { %75 = shalt.err (!%p72_p12)
}
  0x1c   :  { %s76_s0 = scalar_lea.hbm %s127_s1, 256 }
  0x1d   :  { %p77_p13 = scmp.ne.s32.totalorder %s127_s1, %s76_s0  ;;  %p80_p0 = scmp.lt.u32.totalorder %s76_s0, %s127_s1 }
  0x1f   :  { %p82_p1 = pnand %p80_p0, %p77_p13 }
  0x21   :  { %85 = shalt.err (!%p82_p1)
}
  0x22   :  { %34 = dma.vmem_to_hbm [thread:$0]  %s32_s19, 256, %s127_s1, [#allocation4]  }
  0x23   :  { %88 = dma.done.wait [#allocation4], 256  }
  0x24   :  { %89 = vsyncadd [#allocation4], 4294967040 }
  0x25   :  { %38 = vsyncpa [#allocation3], 1 }
  0x26   :  { %39 = vsyncpa [#allocation4], 1 }

</bundles_post_ra>
